<compile_context>
chip_gen: v7x
topology: tpu7x:2x2x1
jax: 0.10.0
libtpu: 0.0.40
codegen_flags: <defaults>
</compile_context>

<pallas_src>
import functools

import jax
import jax.numpy as jnp
from jax.experimental import pallas as pl
from jax.experimental.pallas import tpu as pltpu

_MIB = 1024 * 1024
_TARGET_BLOCK_BYTES = 2 * _MIB   # ~2 MiB f32 slab per grid step: good on v5e..v7x
_MIN_GRID_STEPS = 8              # >= 2x pipeline depth per core on v7x (2 TCs)


def _vmem_limit_bytes():
    """Scoped-VMEM request per generation, with headroom vs physical capacity."""
    try:
        cap = int(pltpu.get_tpu_info().vmem_capacity_bytes)
    except Exception:
        cap = 64 * _MIB          # conservative (v7x per-TensorCore VMEM)
    return int(min(cap // 2, 64 * _MIB))


# ---------------------------------------------------------------------------
# Kernels
# ---------------------------------------------------------------------------
def _actnorm_fused_kernel(x_ref, y_ref, bias_ref, logs_ref, *, scale, inv_n):
    """Resident path: stats + affine for one channel group in one grid step.

    x_ref:    (B, CG, HW)  input block, native dtype (lane dim = H*W)
    y_ref:    (B, CG, HW)  normalized output, native dtype
    bias_ref: (CG, 1)      per-channel -mean (f32)
    logs_ref: (CG, 1)      per-channel log(scale / (std + 1e-6)) (f32)
    """
    x = x_ref[...].astype(jnp.float32)
    # Reduce the batch axis first (VPU adds across vregs), then one cross-lane
    # (XLU) reduction per moment.
    mean = jnp.sum(jnp.sum(x, axis=0), axis=1, keepdims=True) * inv_n    # (CG,1)
    bias = -mean
    xb = bias[None, :, :]
    # Two-pass variance (same numerics as the reference); the centered value is
    # recomputed in the store below instead of keeping a block-sized temporary.
    var = jnp.sum(jnp.sum((x + xb) * (x + xb), axis=0),
                  axis=1, keepdims=True) * inv_n
    s = scale / (jnp.sqrt(var) + 1e-6)                                   # (CG,1)
    y_ref[...] = ((x + xb) * s[None, :, :]).astype(y_ref.dtype)
    bias_ref[...] = bias
    logs_ref[...] = jnp.log(s)


def _actnorm_stats_kernel(x_ref, bias_ref, logs_ref, s_ref, ss_ref, *,
                          scale, inv_n):
    """Fallback pass 1: streaming per-channel sum / sum-of-squares over HW tiles."""
    t = pl.program_id(1)

    @pl.when(t == 0)
    def _():
        s_ref[...] = jnp.zeros_like(s_ref)
        ss_ref[...] = jnp.zeros_like(ss_ref)

    x = x_ref[...].astype(jnp.float32)                                  # (B,CG,hw_t)
    s_ref[...] += jnp.sum(jnp.sum(x, axis=0), axis=1, keepdims=True)
    ss_ref[...] += jnp.sum(jnp.sum(x * x, axis=0), axis=1, keepdims=True)

    @pl.when(t == pl.num_programs(1) - 1)
    def _():
        mean = s_ref[...] * inv_n
        # TODO(synk): single-pass E[x^2]-mean^2 can lose precision when
        # |mean| >> std; the resident fused path (preferred whenever it fits
        # VMEM) reproduces the reference's two-pass numerics exactly.
        var = jnp.maximum(ss_ref[...] * inv_n - mean * mean, 0.0)
        bias_ref[...] = -mean
        logs_ref[...] = jnp.log(scale / (jnp.sqrt(var) + 1e-6))


def _actnorm_affine_kernel(x_ref, bias_ref, logs_ref, y_ref):
    """Fallback pass 2: y = (x + bias) * exp(logs), tile by tile."""
    x = x_ref[...].astype(jnp.float32)
    b = bias_ref[...][None, :, :]                                       # (1,CG,1)
    s = jnp.exp(logs_ref[...])[None, :, :]
    y_ref[...] = ((x + b) * s).astype(y_ref.dtype)


# ---------------------------------------------------------------------------
# Tiling helpers
# ---------------------------------------------------------------------------
def _choose_channel_group(C, per_channel_bytes, target_bytes,
                          min_steps=_MIN_GRID_STEPS):
    """Pick a sublane-aligned channel group: block ~<= target, >= min_steps steps."""
    if C % 8 != 0:
        return C                                   # full-dim block is layout-legal
    cands = [c for c in range(8, C + 1, 8) if C % c == 0]
    fitting = [c for c in cands if c * per_channel_bytes <= target_bytes]
    if not fitting:
        return 8                                   # smallest legal group
    deep = [c for c in fitting if C // c >= min_steps]
    if deep:
        return max(deep)                           # biggest block keeping >=min_steps
    return min(fitting)                            # otherwise maximize step count


def _fused_fits(B, cg, HW, in_itemsize, out_itemsize, vmem_limit):
    blk = B * cg * HW
    # double-buffered in/out blocks + ~3 block-sized f32 live values in the body
    peak = 2 * blk * in_itemsize + 2 * blk * out_itemsize + 3 * blk * 4
    return peak <= int(0.9 * vmem_limit)


def _choose_hw_tile(B, cg, HW, target_bytes):
    if HW % 128 != 0:
        return HW                                  # full-dim lane block
    per_lane = B * cg * 4
    best = 128
    for t in range(128, HW + 1, 128):
        if HW % t == 0 and per_lane * t <= target_bytes:
            best = t
    return best


# ---------------------------------------------------------------------------
# Wrapper
# ---------------------------------------------------------------------------
def actnorm2d_forward(x_nchw, logdet=None, scale=1.0, *,
                      target_block_bytes=_TARGET_BLOCK_BYTES,
                      force_two_pass=False):
    """ActNorm2d.forward(input, logdet, reverse=False) with data-dependent init.

    Returns (y, logdet, bias, logs); bias/logs carry the PyTorch parameter
    shape (1, C, 1, 1) so the post-init module state is observable.
    """
    # TODO(synk): only the reverse=False (encode) path is implemented; the
    # module's reverse direction and its in-place parameter mutation are not
    # reproduced here.
    B, C, H, W = x_nchw.shape
    HW = H * W
    in_dtype = x_nchw.dtype
    x = x_nchw.reshape(B, C, HW)                   # contiguous view, native dtype
    in_b = jnp.dtype(in_dtype).itemsize
    vmem_limit = _vmem_limit_bytes()
    inv_n = 1.0 / float(B * HW)

    cg = _choose_channel_group(C, B * HW * 4, target_block_bytes)
    use_two_pass = force_two_pass or not _fused_fits(B, cg, HW, in_b, in_b,
                                                     vmem_limit)

    if not use_two_pass:
        y, bias, logs = pl.pallas_call(
            functools.partial(_actnorm_fused_kernel,
                              scale=float(scale), inv_n=inv_n),
            out_shape=(
                jax.ShapeDtypeStruct((B, C, HW), in_dtype),
                jax.ShapeDtypeStruct((C, 1), jnp.float32),
                jax.ShapeDtypeStruct((C, 1), jnp.float32),
            ),
            grid=(C // cg,),
            in_specs=[pl.BlockSpec((B, cg, HW), lambda g: (0, g, 0))],
            out_specs=(
                pl.BlockSpec((B, cg, HW), lambda g: (0, g, 0)),
                pl.BlockSpec((cg, 1), lambda g: (g, 0)),
                pl.BlockSpec((cg, 1), lambda g: (g, 0)),
            ),
            compiler_params=pltpu.CompilerParams(
                dimension_semantics=("parallel",),
                vmem_limit_bytes=vmem_limit),
        )(x)
    else:
        # Two-pass fallback: HW-tiled stats with VMEM accumulators, then affine.
        cg2 = 8 if C % 8 == 0 else C
        hw_t = _choose_hw_tile(B, cg2, HW, target_block_bytes)
        grid2 = (C // cg2, HW // hw_t)

        bias, logs = pl.pallas_call(
            functools.partial(_actnorm_stats_kernel,
                              scale=float(scale), inv_n=inv_n),
            out_shape=(
                jax.ShapeDtypeStruct((C, 1), jnp.float32),
                jax.ShapeDtypeStruct((C, 1), jnp.float32),
            ),
            grid=grid2,
            in_specs=[pl.BlockSpec((B, cg2, hw_t), lambda g, t: (0, g, t))],
            out_specs=(
                pl.BlockSpec((cg2, 1), lambda g, t: (g, 0)),
                pl.BlockSpec((cg2, 1), lambda g, t: (g, 0)),
            ),
            scratch_shapes=[pltpu.VMEM((cg2, 1), jnp.float32),
                            pltpu.VMEM((cg2, 1), jnp.float32)],
            compiler_params=pltpu.CompilerParams(
                dimension_semantics=("parallel", "arbitrary"),
                vmem_limit_bytes=vmem_limit),
        )(x)

        y = pl.pallas_call(
            _actnorm_affine_kernel,
            out_shape=jax.ShapeDtypeStruct((B, C, HW), in_dtype),
            grid=grid2,
            in_specs=[pl.BlockSpec((B, cg2, hw_t), lambda g, t: (0, g, t)),
                      pl.BlockSpec((cg2, 1), lambda g, t: (g, 0)),
                      pl.BlockSpec((cg2, 1), lambda g, t: (g, 0))],
            out_specs=pl.BlockSpec((B, cg2, hw_t), lambda g, t: (0, g, t)),
            compiler_params=pltpu.CompilerParams(
                dimension_semantics=("parallel", "parallel"),
                vmem_limit_bytes=vmem_limit),
        )(x, bias, logs)

    y = y.reshape(B, C, H, W)
    bias_param = bias.reshape(1, C, 1, 1)
    logs_param = logs.reshape(1, C, 1, 1)

    if logdet is not None:
        dlogdet = jnp.sum(logs) * float(HW)        # trivial scalar glue
        logdet = jnp.asarray(logdet, jnp.float32) + dlogdet
    return y, logdet, bias_param, logs_param


# ---------------------------------------------------------------------------
# Pure-JAX reference (mirrors the PyTorch module) for correctness checking.
# ---------------------------------------------------------------------------
def _actnorm2d_ref(x, logdet, scale=1.0):
    mean = jnp.mean(x, axis=(0, 2, 3), keepdims=True)
    bias = -mean
    var = jnp.mean((x + bias) ** 2, axis=(0, 2, 3), keepdims=True)
    logs = jnp.log(scale / (jnp.sqrt(var) + 1e-6))
    y = (x + bias) * jnp.exp(logs)
    ld = logdet + jnp.sum(logs) * (x.shape[2] * x.shape[3])
    return y, ld, bias, logs


if __name__ == "__main__":
    key = jax.random.PRNGKey(0)
    k1, k2, k3 = jax.random.split(key, 3)

    # --- small module shape, fused (resident) path ---------------------------
    B, C, H, W = 2, 4, 16, 16
    x = jax.random.normal(k1, (B, C, H, W), jnp.float32) * 1.7 + 0.3
    logdet0 = jnp.zeros((B,), jnp.float32)

    y, logdet, bias, logs = jax.block_until_ready(
        actnorm2d_forward(x, logdet0, scale=1.0))
    y_r, ld_r, bias_r, logs_r = _actnorm2d_ref(x, logdet0, scale=1.0)

    assert y.shape == (B, C, H, W) and logdet.shape == (B,)
    assert bias.shape == (1, C, 1, 1) and logs.shape == (1, C, 1, 1)
    assert bool(jnp.all(jnp.isfinite(y))) and bool(jnp.all(jnp.isfinite(logdet)))
    assert jnp.allclose(y, y_r, rtol=1e-5, atol=1e-4), \
        float(jnp.max(jnp.abs(y - y_r)))
    assert jnp.allclose(logdet, ld_r, rtol=1e-5, atol=1e-2)
    assert jnp.allclose(bias, bias_r, rtol=1e-5, atol=1e-5)
    assert jnp.allclose(logs, logs_r, rtol=1e-5, atol=1e-5)

    # --- multi channel-group grid (C % 8 == 0 -> several parallel steps) -----
    B2, C2, H2, W2 = 2, 32, 16, 16
    x2 = jax.random.normal(k2, (B2, C2, H2, W2), jnp.float32) * 0.9 - 0.2
    ld0_2 = jnp.zeros((B2,), jnp.float32)
    y2, ld2, b2, l2 = jax.block_until_ready(
        actnorm2d_forward(x2, ld0_2, scale=1.0))
    y2_r, ld2_r, b2_r, l2_r = _actnorm2d_ref(x2, ld0_2, scale=1.0)
    assert jnp.allclose(y2, y2_r, rtol=1e-5, atol=1e-4)
    assert jnp.allclose(l2, l2_r, rtol=1e-5, atol=1e-5)
    assert jnp.allclose(ld2, ld2_r, rtol=1e-5, atol=1e-2)

    # --- forced two-pass (HW-tiled) fallback path -----------------------------
    y3, ld3, b3, l3 = jax.block_until_ready(
        actnorm2d_forward(x, logdet0, scale=1.0,
                          force_two_pass=True, target_block_bytes=4096))
    assert jnp.allclose(y3, y_r, rtol=1e-4, atol=2e-4)
    assert jnp.allclose(l3, logs_r, rtol=1e-4, atol=1e-4)
    assert jnp.allclose(ld3, ld_r, rtol=1e-4, atol=1e-2)

    # --- native bf16 I/O (no wrapper upcast; y written back as bf16) ----------
    xb = (jax.random.normal(k3, (B, C, H, W), jnp.float32) * 1.3 + 0.1
          ).astype(jnp.bfloat16)
    yb, ldb, bb, lb = jax.block_until_ready(
        actnorm2d_forward(xb, logdet0, scale=1.0))
    yb_r, _, _, _ = _actnorm2d_ref(xb.astype(jnp.float32), logdet0, scale=1.0)
    assert yb.dtype == jnp.bfloat16
    assert bool(jnp.all(jnp.isfinite(yb.astype(jnp.float32))))
    assert jnp.allclose(yb.astype(jnp.float32), yb_r, rtol=5e-2, atol=5e-2)

    print("KERNEL_OK")
</pallas_src>

<mosaic_0001>
module attributes {stable_mosaic.version = 11 : i64} {
  func.func @_actnorm_fused_kernel(%arg0: i32, %arg1: memref<2x4x256xf32, #tpu.memory_space<vmem>>, %arg2: memref<2x4x256xf32, #tpu.memory_space<vmem>>, %arg3: memref<4x1xf32, #tpu.memory_space<vmem>>, %arg4: memref<4x1xf32, #tpu.memory_space<vmem>>) attributes {dimension_semantics = [#tpu.dimension_semantics<parallel>], iteration_bounds = array<i64: 1>, scalar_prefetch = 0 : i64, scratch_operands = 0 : i64, tpu.core_type = #tpu.core_type<tc>, window_params = [{transform_indices = @transform_0, window_bounds = array<i64: 2, 4, 256>}, {transform_indices = @transform_1, window_bounds = array<i64: 2, 4, 256>}, {transform_indices = @transform_2, window_bounds = array<i64: 4, 1>}, {transform_indices = @transform_3, window_bounds = array<i64: 4, 1>}]} {
    %c0 = arith.constant 0 : index
    %c0_0 = arith.constant 0 : index
    %c0_1 = arith.constant 0 : index
    %0 = vector.load %arg1[%c0, %c0_0, %c0_1] : memref<2x4x256xf32, #tpu.memory_space<vmem>>, vector<2x4x256xf32>
    %cst = arith.constant dense<0.000000e+00> : vector<4x256xf32>
    %1 = vector.multi_reduction <add>, %0, %cst [0] : vector<2x4x256xf32> to vector<4x256xf32>
    %cst_2 = arith.constant dense<0.000000e+00> : vector<4xf32>
    %2 = vector.multi_reduction <add>, %1, %cst_2 [1] : vector<4x256xf32> to vector<4xf32>
    %3 = vector.shape_cast %2 : vector<4xf32> to vector<4x1xf32>
    %cst_3 = arith.constant 0.001953125 : f32
    %4 = vector.broadcast %cst_3 : f32 to vector<4x1xf32>
    %5 = arith.mulf %3, %4 : vector<4x1xf32>
    %cst_4 = arith.constant 0.000000e+00 : f32
    %6 = vector.broadcast %cst_4 : f32 to vector<4x1xf32>
    %7 = arith.subf %6, %5 : vector<4x1xf32>
    %8 = vector.shape_cast %7 : vector<4x1xf32> to vector<1x4x1xf32>
    %9 = vector.broadcast %8 : vector<1x4x1xf32> to vector<2x4x256xf32>
    %10 = arith.addf %0, %9 : vector<2x4x256xf32>
    %11 = vector.broadcast %8 : vector<1x4x1xf32> to vector<2x4x256xf32>
    %12 = arith.addf %0, %11 : vector<2x4x256xf32>
    %13 = arith.mulf %10, %12 : vector<2x4x256xf32>
    %cst_5 = arith.constant dense<0.000000e+00> : vector<4x256xf32>
    %14 = vector.multi_reduction <add>, %13, %cst_5 [0] : vector<2x4x256xf32> to vector<4x256xf32>
    %cst_6 = arith.constant dense<0.000000e+00> : vector<4xf32>
    %15 = vector.multi_reduction <add>, %14, %cst_6 [1] : vector<4x256xf32> to vector<4xf32>
    %16 = vector.shape_cast %15 : vector<4xf32> to vector<4x1xf32>
    %cst_7 = arith.constant 0.001953125 : f32
    %17 = vector.broadcast %cst_7 : f32 to vector<4x1xf32>
    %18 = arith.mulf %16, %17 : vector<4x1xf32>
    %19 = math.sqrt %18 : vector<4x1xf32>
    %cst_8 = arith.constant 9.99999997E-7 : f32
    %20 = vector.broadcast %cst_8 : f32 to vector<4x1xf32>
    %21 = arith.addf %19, %20 : vector<4x1xf32>
    %cst_9 = arith.constant 1.000000e+00 : f32
    %22 = vector.broadcast %cst_9 : f32 to vector<4x1xf32>
    %23 = arith.divf %22, %21 : vector<4x1xf32>
    %24 = vector.broadcast %8 : vector<1x4x1xf32> to vector<2x4x256xf32>
    %25 = arith.addf %0, %24 : vector<2x4x256xf32>
    %26 = vector.shape_cast %23 : vector<4x1xf32> to vector<1x4x1xf32>
    %27 = vector.broadcast %26 : vector<1x4x1xf32> to vector<2x4x256xf32>
    %28 = arith.mulf %25, %27 : vector<2x4x256xf32>
    %c0_10 = arith.constant 0 : index
    %c0_11 = arith.constant 0 : index
    %c0_12 = arith.constant 0 : index
    %29 = vector.load %arg2[%c0_10, %c0_11, %c0_12] : memref<2x4x256xf32, #tpu.memory_space<vmem>>, vector<2x4x256xf32>
    tpu.vector_store %arg2[%c0_10, %c0_11, %c0_12], %28 {strides = array<i32>} : memref<2x4x256xf32, #tpu.memory_space<vmem>>, vector<2x4x256xf32>,
    %c0_13 = arith.constant 0 : index
    %c0_14 = arith.constant 0 : index
    %30 = vector.load %arg3[%c0_13, %c0_14] : memref<4x1xf32, #tpu.memory_space<vmem>>, vector<4x1xf32>
    tpu.vector_store %arg3[%c0_13, %c0_14], %7 {strides = array<i32>} : memref<4x1xf32, #tpu.memory_space<vmem>>, vector<4x1xf32>,
    %31 = math.log %23 : vector<4x1xf32>
    %c0_15 = arith.constant 0 : index
    %c0_16 = arith.constant 0 : index
    %32 = vector.load %arg4[%c0_15, %c0_16] : memref<4x1xf32, #tpu.memory_space<vmem>>, vector<4x1xf32>
    tpu.vector_store %arg4[%c0_15, %c0_16], %31 {strides = array<i32>} : memref<4x1xf32, #tpu.memory_space<vmem>>, vector<4x1xf32>,
    return
  }
  func.func @transform_0(%arg0: i32) -> (i32, i32, i32) {
    %c0_i32 = arith.constant 0 : i32
    %c0_i32_0 = arith.constant 0 : i32
    %c0_i32_1 = arith.constant 0 : i32
    return %c0_i32, %arg0, %c0_i32_0 : i32, i32, i32
  }
  func.func @transform_1(%arg0: i32) -> (i32, i32, i32) {
    %c0_i32 = arith.constant 0 : i32
    %c0_i32_0 = arith.constant 0 : i32
    %c0_i32_1 = arith.constant 0 : i32
    return %c0_i32, %arg0, %c0_i32_0 : i32, i32, i32
  }
  func.func @transform_2(%arg0: i32) -> (i32, i32) {
    %c0_i32 = arith.constant 0 : i32
    %c0_i32_0 = arith.constant 0 : i32
    return %arg0, %c0_i32 : i32, i32
  }
  func.func @transform_3(%arg0: i32) -> (i32, i32) {
    %c0_i32 = arith.constant 0 : i32
    %c0_i32_0 = arith.constant 0 : i32
    return %arg0, %c0_i32 : i32, i32
  }
}

</mosaic_0001>

<bundles_post_ra>
// kernel: tpu_custom_call.1
= control target key start
LH: loop header
LB: loop body
LE: loop exit
PB: predicated region body
PF: predicated region fallthrough
CT: control target
= control target key end

     0   :  { %9 = vsyncpa [#allocation3], 0  ;;  %s268_s0 = inlined_call_operand.hbm [shape: f32[2,4,256], index: 0, kind: input, shape index: {}]   ;;  %s269_s1 = inlined_call_operand.hbm [shape: f32[2,4,256], index: 1, kind: output, shape index: {0}]   ;;  %s270_s2 = inlined_call_operand.vmem [shape: f32[4,1], index: 2, kind: output, shape index: {1}]   ;;  %s271_s3 = inlined_call_operand.vmem [shape: f32[4,1], index: 3, kind: output, shape index: {2}]  }
   0x1   :  { %10 = vsyncpa [#allocation4], 0  ;;  %s193_s12 = smov [#allocation2]   ;;  %s145_s16 = scalar_lea.hbm %s268_s0, 256 }
   0x2   :  { %s16_s13 = sshll.u32 %s193_s12, 4  ;;  %p146_p0 = scmp.ne.s32.totalorder %s268_s0, %s145_s16  ;;  %s17_s13 = int_to_ptr.vmem [resolvable:$true] %s16_s13 }
   0x3   :  { %p149_p1 = scmp.lt.u32.totalorder %s145_s16, %s268_s0 }
   0x5   :  { %p151_p2 = pnand %p149_p1, %p146_p0 }
   0x7   :  { %154 = shalt.err (!%p151_p2)
}
   0x8   :  { %s155_s21 = scalar_lea.vmem %s17_s13, 256  ;;  %p160_p4 = scmp.lt.s32.totalorder %s17_s13, %s17_s13 }
   0x9   :  { %p156_p3 = scmp.ne.s32.totalorder %s17_s13, %s155_s21  ;;  %p161_p5 = scmp.lt.s32.totalorder %s155_s21, %s155_s21 }
   0xb   :  { %p162_p6 = por %p161_p5, %p160_p4 }
   0xd   :  { %p163_p7 = pnand %p162_p6, %p156_p3 }
   0xf   :  { %166 = shalt.err (!%p163_p7)
}
  0x10   :  { %s194_s22 = smov 128   ;;  %s195_s23 = smov 8  }
  0x11   :  { %22 = dma.hbm_to_vmem [thread:$0]  %s268_s0, 256, %s17_s13, [#allocation3], %s194_s22, %s194_s22, %s195_s23  }
  0x12   :  { %189 = dma.done.wait [#allocation3], 256  }
  0x13   :  { %190 = vsyncadd [#allocation3], 4294967040  ;;  %vm34_vm0 = vcmask 1043456   ;;  %v26_v0 = vld [vmem:[#allocation2] sm:$0xff]  ;;  %v27_v1 = vld [vmem:[#allocation2 + $0x8] sm:$0xff]  ;;  %v52_v15 = vlaneseq  ;;  %vm102_vm1 = vcmask 3072  }
  0x14   :  { %v30_v2 = vcombine.high %v26_v0, %v26_v0  ;;  %v31_v3 = vcombine.high %v27_v1, %v27_v1  ;;  %v35_v4 = vsel %vm34_vm0, %v26_v0, 0.0  ;;  %v36_v5 = vsel %vm34_vm0, %v27_v1, 0.0 }
  0x15   :  { %v37_v6 = vadd.f32 %v36_v5, %v35_v4  ;;  %v196_v13 = vmov 839922192   ;;  %v53_v17 = vshrl.u32 %v52_v15, 7 }
  0x16   :  { %v38_v7 = vsel %vm34_vm0, %v30_v2, 0.0  ;;  %v39_v8 = vsel %vm34_vm0, %v31_v3, 0.0  ;;  %v50_v14 = vunpack.c.l.s4 %v196_v13 }
  0x17   :  { %v40_v9 = vadd.f32 %v39_v8, %v38_v7  ;;  %v41_v10 = vsel %vm34_vm0, %v37_v6, 0.0 }
  0x18   :  { %v51_v16 = vunpack.c.0.s8 %v50_v14 }
  0x19   :  { %v42_v11 = vsel %vm34_vm0, %v40_v9, 0.0 }
  0x1a   :  { %v43_v12 = vadd.f32 %v42_v11, %v41_v10  ;;  %v54_v19 = vsub.s32 %v51_v16, %v53_v17 }
  0x1c   :  { %44 = vadd.xlane.f32.xlu0 %v43_v12 }
  0xa9   :  { %v45_v18 = vpop.xlane.xlu0 %44 }
  0xaa   :  { %v46_v20 = vmul.f32 0.001953125, %v45_v18 }
  0xac   :  { %v47_v21 = vsub.f32 0.0, %v46_v20 }
  0xae   :  { %v55_v22 = vrot.slane %v47_v21, %v54_v19  ;;  %103 = vst.msk [vmem:[%s270_s2] sm:$0xf] %vm102_vm1, %v47_v21  ;;  %s197_s2 = smov [#allocation5]  }
  0xaf   :  { %s112_s27 = sshll.u32 %s197_s2, 4  ;;  %s113_s27 = int_to_ptr.vmem [resolvable:$true] %s112_s27 }
  0xb0   :  { %v57_v23 = vadd.f32 %v55_v22, %v26_v0  ;;  %v58_v24 = vadd.f32 %v55_v22, %v27_v1  ;;  %s167_s28 = scalar_lea.vmem %s113_s27, 256  ;;  %p172_p9 = scmp.lt.s32.totalorder %s113_s27, %s113_s27 }
  0xb1   :  { %p168_p8 = scmp.ne.s32.totalorder %s113_s27, %s167_s28  ;;  %p173_p10 = scmp.lt.s32.totalorder %s167_s28, %s167_s28 }
  0xb2   :  { %v59_v25 = vmul.f32 %v57_v23, %v57_v23  ;;  %v60_v26 = vmul.f32 %v58_v24, %v58_v24 }
  0xb3   :  { %p174_p11 = por %p173_p10, %p172_p9 }
  0xb4   :  { %v63_v27 = vcombine.high %v59_v25, %v59_v25  ;;  %v64_v28 = vcombine.high %v60_v26, %v60_v26  ;;  %v67_v29 = vsel %vm34_vm0, %v59_v25, 0.0  ;;  %v68_v30 = vsel %vm34_vm0, %v60_v26, 0.0 }
  0xb5   :  { %v69_v31 = vadd.f32 %v68_v30, %v67_v29  ;;  %p175_p12 = pnand %p174_p11, %p168_p8 }
  0xb6   :  { %v70_v32 = vsel %vm34_vm0, %v63_v27, 0.0  ;;  %v71_v33 = vsel %vm34_vm0, %v64_v28, 0.0 }
  0xb7   :  { %v72_v34 = vadd.f32 %v71_v33, %v70_v32  ;;  %v73_v35 = vsel %vm34_vm0, %v69_v31, 0.0 }
  0xb9   :  { %v74_v36 = vsel %vm34_vm0, %v72_v34, 0.0 }
  0xba   :  { %v75_v37 = vadd.f32 %v74_v36, %v73_v35 }
  0xbc   :  { %76 = vadd.xlane.f32.xlu0 %v75_v37 }
 0x149   :  { %v77_v38 = vpop.xlane.xlu0 %76 }
 0x14a   :  { %v78_v39 = vmul.f32 0.001953125, %v77_v38 }
 0x14c   :  { %139 = vrsqrt.f32 %v78_v39  ;;  %vm81_vm2 = vcmp.eq.f32.partialorder %v78_v39, inf  ;;  %v84_v42 = vand.u32 2147483648, %v78_v39  ;;  %vm83_vm3 = vcmp.eq.f32.partialorder %v78_v39, 0.0 }
 0x156   :  { %v140_v40 = vpop.eup %139 }
 0x157   :  { %v80_v41 = vmul.f32 %v140_v40, %v78_v39 }
 0x159   :  { %v82_v43 = vsel %vm81_vm2, %v78_v39, %v80_v41 }
 0x15a   :  { %v85_v44 = vsel %vm83_vm3, %v84_v42, %v82_v43 }
 0x15b   :  { %v86_v45 = vadd.f32 1e-06, %v85_v44 }
 0x15d   :  { %141 = vrcp.f32 %v86_v45 }
 0x167   :  { %v142_v46 = vpop.eup %141 }
 0x168   :  { %v96_v47 = vrot.slane %v142_v46, %v54_v19  ;;  %143 = vlog2.f32 %v142_v46 }
 0x16a   :  { %v98_v48 = vmul.f32 %v96_v47, %v57_v23  ;;  %v99_v49 = vmul.f32 %v96_v47, %v58_v24 }
 0x16c   :  { %100 = vst [vmem:[#allocation5] sm:$0xff] %v98_v48  ;;  %101 = vst [vmem:[#allocation5 + $0x8] sm:$0xff] %v99_v49 }
 0x16d   :  { %178 = shalt.err (!%p175_p12)
}
 0x16e   :  { %s179_s4 = scalar_lea.hbm %s269_s1, 256 }
 0x16f   :  { %p180_p13 = scmp.ne.s32.totalorder %s269_s1, %s179_s4  ;;  %p183_p0 = scmp.lt.u32.totalorder %s179_s4, %s269_s1 }
 0x171   :  { %p185_p1 = pnand %p183_p0, %p180_p13 }
 0x173   :  { %188 = shalt.err (!%p185_p1)
}
 0x174   :  { %118 = dma.vmem_to_hbm [thread:$0]  %s113_s27, 256, %s269_s1, [#allocation4], %s194_s22, %s194_s22, %s195_s23   ;;  %v144_v50 = vpop.eup %143 }
 0x175   :  { %v105_v51 = vmul.f32 0.6931472, %v144_v50 }
 0x177   :  { %106 = vst.msk [vmem:[%s271_s3] sm:$0xf] %vm102_vm1, %v105_v51 }
 0x178   :  { %191 = dma.done.wait [#allocation4], 256  }
 0x179   :  { %192 = vsyncadd [#allocation4], 4294967040 }
 0x17a   :  { %130 = vsyncpa [#allocation3], 1 }
 0x17b   :  { %131 = vsyncpa [#allocation4], 1 }

</bundles_post_ra>
